<compile_context>
chip_gen: v7x
topology: tpu7x:2x2x1
jax: 0.10.0
libtpu: 0.0.40
codegen_flags: <defaults>
</compile_context>

<pallas_src>
import functools

import jax
import jax.numpy as jnp
from jax.experimental import pallas as pl
from jax.experimental.pallas import tpu as pltpu


def _categorical_policy_kernel(x_ref, g_ref, *rest, has_a):
    if has_a:
        a_ref = rest[0]
        w0_ref, b0_ref, w1_ref, b1_ref, w2_ref, b2_ref, out_ref = rest[1:]
    else:
        a_ref = None
        w0_ref, b0_ref, w1_ref, b1_ref, w2_ref, b2_ref, out_ref = rest

    # ---- MLP, transposed activations: batch on the 128-lane axis ----
    x = x_ref[...]                                                        # (TB, D) native layout
    h = jnp.tanh(
        jax.lax.dot_general(w0_ref[...], x, (((1,), (1,)), ((), ())),
                            preferred_element_type=jnp.float32)
        + b0_ref[...])                                                    # (H0, TB)
    h = jnp.tanh(jnp.dot(w1_ref[...], h, preferred_element_type=jnp.float32)
                 + b1_ref[...])                                           # (H1, TB)
    logits = (jnp.dot(w2_ref[...], h, preferred_element_type=jnp.float32)
              + b2_ref[...])                                              # (A, TB)

    A, TB = logits.shape
    row = jax.lax.broadcasted_iota(jnp.int32, (A, TB), 0)                 # action index per row

    # ---- numerically stable log-softmax pieces (reductions over the action axis) ----
    m = jnp.max(logits, axis=0, keepdims=True)                            # (1, TB)
    lse = jnp.log(jnp.sum(jnp.exp(logits - m), axis=0, keepdims=True))    # (1, TB)

    # ---- Categorical sample via Gumbel-max (noise precomputed on the host) ----
    perturbed = logits + g_ref[...]
    pmax = jnp.max(perturbed, axis=0, keepdims=True)                      # (1, TB)
    row_f = row.astype(jnp.float32)
    pi_f = jnp.min(jnp.where(perturbed == pmax, row_f, jnp.float32(A)),
                   axis=0, keepdims=True)                                 # min-index tie-break
    pi = pi_f.astype(jnp.int32)                                           # (1, TB)

    # logp_pi = log_softmax(logits)[pi] : gather the selected logit, skip full log-softmax
    logit_pi = jnp.sum(jnp.where(row == pi, logits, 0.0), axis=0, keepdims=True)
    logp_pi = logit_pi - m - lse

    if has_a:
        logit_a = jnp.sum(jnp.where(row == a_ref[...], logits, 0.0), axis=0, keepdims=True)
        logp = logit_a - m - lse
    else:
        logp = jnp.zeros_like(logp_pi)

    # One lane-dense (3, TB) store: row0 = pi (as f32, exact for small A), row1 = logp,
    # row2 = logp_pi.
    out_ref[...] = jnp.concatenate([pi_f, logp, logp_pi], axis=0)


def _round_up(n, m):
    return ((n + m - 1) // m) * m


def categorical_policy(x, params, a=None, seed=0, *, tb=4096):
    """Matches CategoricalPolicy.forward: returns (pi, logp, logp_pi).
    If a is None, logp is None (as in the torch module)."""
    (w0, b0), (w1, b1), (w2, b2) = params                                 # W: (out, in), b: (out, 1)
    B, D = x.shape
    A = w2.shape[0]
    has_a = a is not None

    # Batch tile: multiple of 128, as large as the batch allows, but capped so the
    # "parallel" batch axis has >= 2 steps when B >= 256 (both TensorCores on v7x).
    TB = min(_round_up(max(int(tb), 128), 128), _round_up(B, 128))
    if B >= 256 and TB >= _round_up(B, 128):
        TB = max(128, _round_up(pl.cdiv(B, 2), 128))
    grid = (pl.cdiv(B, TB),)

    x = x.astype(jnp.float32)                                             # native (B, D)
    gumbel = jax.random.gumbel(jax.random.PRNGKey(seed), (A, B), jnp.float32)

    pin = lambda i: (0, 0)      # weights/biases: resident in VMEM across grid steps
    col = lambda i: (0, i)      # batch-on-lanes tiled arrays

    in_specs = [
        pl.BlockSpec((TB, D), lambda i: (i, 0)),    # x, native layout
        pl.BlockSpec((A, TB), col),                 # gumbel noise
    ]
    args = [x, gumbel]
    if has_a:
        in_specs.append(pl.BlockSpec((1, TB), col))  # a (1, B) int32, batch on lanes
        args.append(a.astype(jnp.int32).reshape(1, B))
    in_specs += [
        pl.BlockSpec(w0.shape, pin), pl.BlockSpec(b0.shape, pin),
        pl.BlockSpec(w1.shape, pin), pl.BlockSpec(b1.shape, pin),
        pl.BlockSpec(w2.shape, pin), pl.BlockSpec(b2.shape, pin),
    ]
    args += [w0, b0, w1, b1, w2, b2]

    out = pl.pallas_call(
        functools.partial(_categorical_policy_kernel, has_a=has_a),
        out_shape=jax.ShapeDtypeStruct((3, B), jnp.float32),
        grid=grid,
        in_specs=in_specs,
        out_specs=pl.BlockSpec((3, TB), col),
        compiler_params=pltpu.CompilerParams(
            dimension_semantics=("parallel",),
            vmem_limit_bytes=32 * 1024 * 1024),
    )(*args)

    pi_out = out[0, :B].astype(jnp.int32)
    logp_out = out[1, :B] if has_a else None
    logp_pi_out = out[2, :B]
    return pi_out, logp_out, logp_pi_out


def init_mlp_params(key, layer_sizes):
    """nn.Linear-style init: W ~ U(-1/sqrt(fan_in), +1/sqrt(fan_in)), shape (out, in)
    (PyTorch weight layout); bias = 0 (matches nn.init.zeros_)."""
    params = []
    for fan_in, fan_out in zip(layer_sizes[:-1], layer_sizes[1:]):
        key, sub = jax.random.split(key)
        bound = float(fan_in) ** -0.5
        w = jax.random.uniform(sub, (fan_out, fan_in), jnp.float32, -bound, bound)
        b = jnp.zeros((fan_out, 1), jnp.float32)
        params.append((w, b))
    return params


if __name__ == "__main__":
    # Small shapes consistent with the module: x is (batch, input_dim).
    batch, input_dim, hidden_dims, action_dim = 256, 32, (64, 64), 8

    root = jax.random.PRNGKey(0)
    k_w, k_x, k_a = jax.random.split(root, 3)

    params = init_mlp_params(k_w, [input_dim] + list(hidden_dims) + [action_dim])
    x = jax.random.normal(k_x, (batch, input_dim), jnp.float32)
    a = jax.random.randint(k_a, (batch,), 0, action_dim, jnp.int32)

    # With B=256 the tile clamp gives TB=128 -> grid of 2 batch tiles.
    pi, logp, logp_pi = categorical_policy(x, params, a, seed=42)
    jax.block_until_ready((pi, logp, logp_pi))

    # sanity: shapes, actions in range, log-probs finite and <= 0
    assert pi.shape == (batch,) and logp.shape == (batch,) and logp_pi.shape == (batch,)
    assert bool(jnp.all((pi >= 0) & (pi < action_dim)))
    assert bool(jnp.all(jnp.isfinite(logp))) and bool(jnp.all(jnp.isfinite(logp_pi)))
    assert bool(jnp.all(logp <= 0.0)) and bool(jnp.all(logp_pi <= 0.0))

    # also exercise the a=None (inference) path: no action stream, logp is None
    pi2, logp2, logp_pi2 = categorical_policy(x, params, None, seed=7)
    jax.block_until_ready((pi2, logp_pi2))
    assert logp2 is None and pi2.shape == (batch,) and logp_pi2.shape == (batch,)
    assert bool(jnp.all((pi2 >= 0) & (pi2 < action_dim)))

    print("KERNEL_OK")
</pallas_src>

<mosaic_0001>
module attributes {stable_mosaic.version = 11 : i64} {
  func.func @_categorical_policy_kernel(%arg0: i32, %arg1: memref<128x32xf32, #tpu.memory_space<vmem>>, %arg2: memref<8x128xf32, #tpu.memory_space<vmem>>, %arg3: memref<1x128xi32, #tpu.memory_space<vmem>>, %arg4: memref<64x32xf32, #tpu.memory_space<vmem>>, %arg5: memref<64x1xf32, #tpu.memory_space<vmem>>, %arg6: memref<64x64xf32, #tpu.memory_space<vmem>>, %arg7: memref<64x1xf32, #tpu.memory_space<vmem>>, %arg8: memref<8x64xf32, #tpu.memory_space<vmem>>, %arg9: memref<8x1xf32, #tpu.memory_space<vmem>>, %arg10: memref<3x128xf32, #tpu.memory_space<vmem>>) attributes {dimension_semantics = [#tpu.dimension_semantics<parallel>], iteration_bounds = array<i64: 2>, scalar_prefetch = 0 : i64, scratch_operands = 0 : i64, tpu.core_type = #tpu.core_type<tc>, window_params = [{transform_indices = @transform_0, window_bounds = array<i64: 128, 32>}, {transform_indices = @transform_1, window_bounds = array<i64: 8, 128>}, {transform_indices = @transform_2, window_bounds = array<i64: 1, 128>}, {pipeline_mode = #tpu.pipeline_mode<synchronous>, transform_indices = @transform_3, window_bounds = array<i64: 64, 32>}, {pipeline_mode = #tpu.pipeline_mode<synchronous>, transform_indices = @transform_4, window_bounds = array<i64: 64, 1>}, {pipeline_mode = #tpu.pipeline_mode<synchronous>, transform_indices = @transform_5, window_bounds = array<i64: 64, 64>}, {pipeline_mode = #tpu.pipeline_mode<synchronous>, transform_indices = @transform_6, window_bounds = array<i64: 64, 1>}, {pipeline_mode = #tpu.pipeline_mode<synchronous>, transform_indices = @transform_7, window_bounds = array<i64: 8, 64>}, {pipeline_mode = #tpu.pipeline_mode<synchronous>, transform_indices = @transform_8, window_bounds = array<i64: 8, 1>}, {transform_indices = @transform_9, window_bounds = array<i64: 3, 128>}]} {
    %c0 = arith.constant 0 : index
    %c0_0 = arith.constant 0 : index
    %0 = vector.load %arg1[%c0, %c0_0] : memref<128x32xf32, #tpu.memory_space<vmem>>, vector<128x32xf32>
    %c0_1 = arith.constant 0 : index
    %c0_2 = arith.constant 0 : index
    %1 = vector.load %arg4[%c0_1, %c0_2] : memref<64x32xf32, #tpu.memory_space<vmem>>, vector<64x32xf32>
    %cst = arith.constant dense<0.000000e+00> : vector<64x128xf32>
    %2 = tpu.matmul %1, %0, %cst {dimension_numbers = #tpu.dot_dimension_numbers<[1], [1], [0], [0], [0, 0, 1, 0], [], []>} : vector<64x32xf32>, vector<128x32xf32>, vector<64x128xf32> -> vector<64x128xf32>
    %c0_3 = arith.constant 0 : index
    %c0_4 = arith.constant 0 : index
    %3 = vector.load %arg5[%c0_3, %c0_4] : memref<64x1xf32, #tpu.memory_space<vmem>>, vector<64x1xf32>
    %4 = vector.broadcast %3 : vector<64x1xf32> to vector<64x128xf32>
    %5 = arith.addf %2, %4 : vector<64x128xf32>
    %6 = math.tanh %5 : vector<64x128xf32>
    %c0_5 = arith.constant 0 : index
    %c0_6 = arith.constant 0 : index
    %7 = vector.load %arg6[%c0_5, %c0_6] : memref<64x64xf32, #tpu.memory_space<vmem>>, vector<64x64xf32>
    %cst_7 = arith.constant dense<0.000000e+00> : vector<64x128xf32>
    %8 = tpu.matmul %7, %6, %cst_7 {dimension_numbers = #tpu.dot_dimension_numbers<[1], [0], [0], [1], [0, 0, 1, 1], [], []>} : vector<64x64xf32>, vector<64x128xf32>, vector<64x128xf32> -> vector<64x128xf32>
    %c0_8 = arith.constant 0 : index
    %c0_9 = arith.constant 0 : index
    %9 = vector.load %arg7[%c0_8, %c0_9] : memref<64x1xf32, #tpu.memory_space<vmem>>, vector<64x1xf32>
    %10 = vector.broadcast %9 : vector<64x1xf32> to vector<64x128xf32>
    %11 = arith.addf %8, %10 : vector<64x128xf32>
    %12 = math.tanh %11 : vector<64x128xf32>
    %c0_10 = arith.constant 0 : index
    %c0_11 = arith.constant 0 : index
    %13 = vector.load %arg8[%c0_10, %c0_11] : memref<8x64xf32, #tpu.memory_space<vmem>>, vector<8x64xf32>
    %cst_12 = arith.constant dense<0.000000e+00> : vector<8x128xf32>
    %14 = tpu.matmul %13, %12, %cst_12 {dimension_numbers = #tpu.dot_dimension_numbers<[1], [0], [0], [1], [0, 0, 1, 1], [], []>} : vector<8x64xf32>, vector<64x128xf32>, vector<8x128xf32> -> vector<8x128xf32>
    %c0_13 = arith.constant 0 : index
    %c0_14 = arith.constant 0 : index
    %15 = vector.load %arg9[%c0_13, %c0_14] : memref<8x1xf32, #tpu.memory_space<vmem>>, vector<8x1xf32>
    %16 = vector.broadcast %15 : vector<8x1xf32> to vector<8x128xf32>
    %17 = arith.addf %14, %16 : vector<8x128xf32>
    %18 = tpu.iota {dimensions = array<i32: 0>} : vector<8x128xi32>
    %cst_15 = arith.constant dense<0xFF800000> : vector<128xf32>
    %19 = vector.multi_reduction <maximumf>, %17, %cst_15 [0] : vector<8x128xf32> to vector<128xf32>
    %20 = vector.shape_cast %19 : vector<128xf32> to vector<1x128xf32>
    %21 = vector.broadcast %20 : vector<1x128xf32> to vector<8x128xf32>
    %22 = arith.subf %17, %21 : vector<8x128xf32>
    %23 = math.exp %22 : vector<8x128xf32>
    %cst_16 = arith.constant dense<0.000000e+00> : vector<128xf32>
    %24 = vector.multi_reduction <add>, %23, %cst_16 [0] : vector<8x128xf32> to vector<128xf32>
    %25 = vector.shape_cast %24 : vector<128xf32> to vector<1x128xf32>
    %26 = math.log %25 : vector<1x128xf32>
    %c0_17 = arith.constant 0 : index
    %c0_18 = arith.constant 0 : index
    %27 = vector.load %arg2[%c0_17, %c0_18] : memref<8x128xf32, #tpu.memory_space<vmem>>, vector<8x128xf32>
    %28 = arith.addf %17, %27 : vector<8x128xf32>
    %cst_19 = arith.constant dense<0xFF800000> : vector<128xf32>
    %29 = vector.multi_reduction <maximumf>, %28, %cst_19 [0] : vector<8x128xf32> to vector<128xf32>
    %30 = vector.shape_cast %29 : vector<128xf32> to vector<1x128xf32>
    %31 = arith.sitofp %18 : vector<8x128xi32> to vector<8x128xf32>
    %32 = vector.broadcast %30 : vector<1x128xf32> to vector<8x128xf32>
    %33 = arith.cmpf oeq, %28, %32 : vector<8x128xf32>
    %cst_20 = arith.constant 8.000000e+00 : f32
    %34 = vector.broadcast %cst_20 : f32 to vector<8x128xf32>
    %35 = arith.select %33, %31, %34 : vector<8x128xi1>, vector<8x128xf32>
    %cst_21 = arith.constant dense<0x7F800000> : vector<128xf32>
    %36 = vector.multi_reduction <minimumf>, %35, %cst_21 [0] : vector<8x128xf32> to vector<128xf32>
    %37 = vector.shape_cast %36 : vector<128xf32> to vector<1x128xf32>
    %38 = arith.fptosi %37 : vector<1x128xf32> to vector<1x128xi32>
    %39 = vector.broadcast %38 : vector<1x128xi32> to vector<8x128xi32>
    %40 = arith.cmpi eq, %18, %39 : vector<8x128xi32>
    %cst_22 = arith.constant 0.000000e+00 : f32
    %41 = vector.broadcast %cst_22 : f32 to vector<8x128xf32>
    %42 = arith.select %40, %17, %41 : vector<8x128xi1>, vector<8x128xf32>
    %cst_23 = arith.constant dense<0.000000e+00> : vector<128xf32>
    %43 = vector.multi_reduction <add>, %42, %cst_23 [0] : vector<8x128xf32> to vector<128xf32>
    %44 = vector.shape_cast %43 : vector<128xf32> to vector<1x128xf32>
    %45 = arith.subf %44, %20 : vector<1x128xf32>
    %46 = arith.subf %45, %26 : vector<1x128xf32>
    %c0_24 = arith.constant 0 : index
    %c0_25 = arith.constant 0 : index
    %47 = vector.load %arg3[%c0_24, %c0_25] : memref<1x128xi32, #tpu.memory_space<vmem>>, vector<1x128xi32>
    %48 = vector.broadcast %47 : vector<1x128xi32> to vector<8x128xi32>
    %49 = arith.cmpi eq, %18, %48 : vector<8x128xi32>
    %cst_26 = arith.constant 0.000000e+00 : f32
    %50 = vector.broadcast %cst_26 : f32 to vector<8x128xf32>
    %51 = arith.select %49, %17, %50 : vector<8x128xi1>, vector<8x128xf32>
    %cst_27 = arith.constant dense<0.000000e+00> : vector<128xf32>
    %52 = vector.multi_reduction <add>, %51, %cst_27 [0] : vector<8x128xf32> to vector<128xf32>
    %53 = vector.shape_cast %52 : vector<128xf32> to vector<1x128xf32>
    %54 = arith.subf %53, %20 : vector<1x128xf32>
    %55 = arith.subf %54, %26 : vector<1x128xf32>
    %56 = tpu.concatenate %37, %55, %46 in 0 : vector<1x128xf32>, vector<1x128xf32>, vector<1x128xf32> -> vector<3x128xf32>
    %c0_28 = arith.constant 0 : index
    %c0_29 = arith.constant 0 : index
    %57 = vector.load %arg10[%c0_28, %c0_29] : memref<3x128xf32, #tpu.memory_space<vmem>>, vector<3x128xf32>
    tpu.vector_store %arg10[%c0_28, %c0_29], %56 {strides = array<i32>} : memref<3x128xf32, #tpu.memory_space<vmem>>, vector<3x128xf32>,
    return
  }
  func.func @transform_0(%arg0: i32) -> (i32, i32) {
    %c0_i32 = arith.constant 0 : i32
    %c0_i32_0 = arith.constant 0 : i32
    return %arg0, %c0_i32 : i32, i32
  }
  func.func @transform_1(%arg0: i32) -> (i32, i32) {
    %c0_i32 = arith.constant 0 : i32
    %c0_i32_0 = arith.constant 0 : i32
    return %c0_i32, %arg0 : i32, i32
  }
  func.func @transform_2(%arg0: i32) -> (i32, i32) {
    %c0_i32 = arith.constant 0 : i32
    %c0_i32_0 = arith.constant 0 : i32
    return %c0_i32, %arg0 : i32, i32
  }
  func.func @transform_3(%arg0: i32) -> (i32, i32) {
    %c0_i32 = arith.constant 0 : i32
    %c0_i32_0 = arith.constant 0 : i32
    %c0_i32_1 = arith.constant 0 : i32
    return %c0_i32, %c0_i32_0 : i32, i32
  }
  func.func @transform_4(%arg0: i32) -> (i32, i32) {
    %c0_i32 = arith.constant 0 : i32
    %c0_i32_0 = arith.constant 0 : i32
    %c0_i32_1 = arith.constant 0 : i32
    return %c0_i32, %c0_i32_0 : i32, i32
  }
  func.func @transform_5(%arg0: i32) -> (i32, i32) {
    %c0_i32 = arith.constant 0 : i32
    %c0_i32_0 = arith.constant 0 : i32
    %c0_i32_1 = arith.constant 0 : i32
    return %c0_i32, %c0_i32_0 : i32, i32
  }
  func.func @transform_6(%arg0: i32) -> (i32, i32) {
    %c0_i32 = arith.constant 0 : i32
    %c0_i32_0 = arith.constant 0 : i32
    %c0_i32_1 = arith.constant 0 : i32
    return %c0_i32, %c0_i32_0 : i32, i32
  }
  func.func @transform_7(%arg0: i32) -> (i32, i32) {
    %c0_i32 = arith.constant 0 : i32
    %c0_i32_0 = arith.constant 0 : i32
    %c0_i32_1 = arith.constant 0 : i32
    return %c0_i32, %c0_i32_0 : i32, i32
  }
  func.func @transform_8(%arg0: i32) -> (i32, i32) {
    %c0_i32 = arith.constant 0 : i32
    %c0_i32_0 = arith.constant 0 : i32
    %c0_i32_1 = arith.constant 0 : i32
    return %c0_i32, %c0_i32_0 : i32, i32
  }
  func.func @transform_9(%arg0: i32) -> (i32, i32) {
    %c0_i32 = arith.constant 0 : i32
    %c0_i32_0 = arith.constant 0 : i32
    return %c0_i32, %arg0 : i32, i32
  }
}

</mosaic_0001>

<bundles_post_ra>
// kernel: tpu_custom_call.1
= control target key start
LH: loop header
LB: loop body
LE: loop exit
PB: predicated region body
PF: predicated region fallthrough
CT: control target
= control target key end

     0   :  { %14 = vsyncpa [#allocation3], 0  ;;  %s1807_s0 = inlined_call_operand.vmem [shape: f32[256,32], index: 0, kind: input, shape index: {}]   ;;  %s1808_s1 = inlined_call_operand.vmem [shape: f32[8,256], index: 1, kind: input, shape index: {}]   ;;  %s1809_s2 = inlined_call_operand.vmem [shape: s32[1,256], index: 2, kind: input, shape index: {}]   ;;  %s1810_s3 = inlined_call_operand.vmem [shape: f32[64,32], index: 3, kind: input, shape index: {}]   ;;  %s1811_s4 = inlined_call_operand.vmem [shape: f32[64,1], index: 4, kind: input, shape index: {}]   ;;  %s1812_s5 = inlined_call_operand.vmem [shape: f32[64,64], index: 5, kind: input, shape index: {}]   ;;  %s1813_s6 = inlined_call_operand.vmem [shape: f32[64,1], index: 6, kind: input, shape index: {}]   ;;  %s1814_s7 = inlined_call_operand.vmem [shape: f32[8,64], index: 7, kind: input, shape index: {}]   ;;  %s1815_s8 = inlined_call_operand.vmem [shape: f32[8,1], index: 8, kind: input, shape index: {}]   ;;  %s1816_s9 = inlined_call_operand.hbm [shape: f32[3,256], index: 9, kind: output, shape index: {}]  }
   0x1   :  { %16 = vsyncpa [#allocation3 + $0x1], 0  ;;  %s1521_s30 = smov 0   ;;  %s1523_s10 = smov 0  }
   0x2   :  { %s1525_s11 = smov 0   ;;  %s1527_s12 = smov 0  }
   0x3 LB: > { %s1542_s13 = sadd.s32 4294967295, %s1464_s12   ;;  %s1057_s14 = sadd.s32 4294967294, %s1464_s12   ;;  %s1464_s12 = sphi %s1527_s12, %s1824_s12   ;;  %s1460_s11 = sphi %s1525_s11, %s1823_s11   ;;  %s1456_s10 = sphi %s1523_s10, %s1822_s10   ;;  %s1452_s30 = sphi %s1521_s30, %s1821_s30  }
   0x4   : > { %s1546_s15 = sadd.s32 1, %s1464_s12   ;;  %s233_s16 = sadd.s32 1, %s1460_s11 }
   0x5   : > { %s230_s17 = ssub.s32 %s1464_s12, %s1546_s15  ;;  %p243_p0 = scmp.ne.s32.totalorder %s1460_s11, %s1456_s10 }
   0x6   : > { %p231_p1 = scmp.eq.s32.totalorder %s230_s17, 0  ;;  %p244_p2 = scmp.eq.s32.totalorder %s1542_s13, 1 }
   0x7   : > { %p249_p3 = scmp.ne.s32.totalorder %s1456_s10, %s1452_s30  ;;  %p250_p4 = scmp.eq.s32.totalorder %s1057_s14, 1 }
   0x8   : > { %s1557_s18 = scalar_select %p231_p1, %s1460_s11, %s233_s16  }
   0x9   : > { %p1559_p5 = por %p244_p2, %p243_p0  ;;  %p1563_p6 = por %p250_p4, %p249_p3 }
   0xa   : > { %p1060_p7 = scmp.ge.s32.totalorder %s1464_s12, 1  ;;  %p308_p8 = scmp.lt.s32.totalorder %s1464_s12, 3 }
   0xc   : > { %p309_p9 = pnand %p1060_p7, %p308_p8 }
   0xd   : > { %s1062_s21 = sshll.u32 (!%p309_p9), %s1542_s13, 4  ;;  %vm436_vm0 = vcmask (!%p309_p9), 261120   ;;  %v380_v0 = vld [vmem:[%s1810_s3] sm:$0xff] (!%p309_p9)  ;;  %v1466_v1 = vmov (!%p309_p9), 0   ;;  %v390_v3 = vld [vmem:[%s1811_s4 + $0x10] sm:$0xff] (!%p309_p9)  ;;  %v389_v4 = vld [vmem:[%s1811_s4 + $0x8] sm:$0xff] (!%p309_p9) }
   0xe   : > { %312 = sbr.rel (%p309_p9) target bundleno = 862 (0x35e), region = 56  ;;  %p352_p10 = scmp.lt.s32.totalorder (!%p309_p9), %s1062_s21, 31  ;;  %1184 = vmatprep.mubr.msk.f32.mxu0 (!%p309_p9), %vm436_vm0, %v380_v0  ;;  %1364 = vset.pattern.permute.xlu0 (!%p309_p9), %v1466_v1  ;;  %v388_v2 = vld [vmem:[%s1811_s4] sm:$0xff] (!%p309_p9)  ;;  %v391_v5 = vld [vmem:[%s1811_s4 + $0x18] sm:$0xff] (!%p309_p9)  ;;  %vm1593_vm1 = vmpackc.low (!%p309_p9), %vm436_vm0, %vm436_vm0  ;;  %vm678_vm2 = vcmask (!%p309_p9), 523264   ;;  %vm1468_vm3 = vmmov (!%p309_p9), 0  }
   0xf   : > { %1365 = vset.pattern.permute.xlu1 (!%p309_p9), %v1466_v1  ;;  %398 = vperm.xlu0 (!%p309_p9), %1364, %v388_v2   ;;  %v392_v13 = vld [vmem:[%s1811_s4 + $0x20] sm:$0xff] (!%p309_p9)  ;;  %v393_v14 = vld [vmem:[%s1811_s4 + $0x28] sm:$0xff] (!%p309_p9)  ;;  %v394_v17 = vld [vmem:[%s1811_s4 + $0x30] sm:$0xff] (!%p309_p9)  ;;  %p357_p11 = scmp.lt.s32.totalorder (!%p309_p9), %s1542_s13, 1  ;;  %vm958_vm7 = vcmask (!%p309_p9), 1040384   ;;  %s1100_s22 = sshll.u32 (!%p309_p9), %s1542_s13, 6 }
  0x10   : > { %408 = vperm.xlu1 (!%p309_p9), %1365, %v390_v3   ;;  %v395_v18 = vld [vmem:[%s1811_s4 + $0x38] sm:$0xff] (!%p309_p9)  ;;  %v630_v20 = vld [vmem:[%s1813_s6] sm:$0xff] (!%p309_p9)  ;;  %v631_v21 = vld [vmem:[%s1813_s6 + $0x8] sm:$0xff] (!%p309_p9)  ;;  %vm960_vm8 = vcmask (!%p309_p9), 1041408   ;;  %s1765_s27 = scalar_lea.hbm (!%p309_p9), %s1816_s9, %s1100_s22  ;;  %s1470_s29 = smov (!%p309_p9), [#allocation2]  }
  0x11   : > { %v632_v24 = vld [vmem:[%s1813_s6 + $0x10] sm:$0xff] (!%p309_p9)  ;;  %v633_v25 = vld [vmem:[%s1813_s6 + $0x18] sm:$0xff] (!%p309_p9)  ;;  %v634_v27 = vld [vmem:[%s1813_s6 + $0x20] sm:$0xff] (!%p309_p9)  ;;  %s1406_s14 = sshll.u32 (!%p309_p9), %s1470_s29, 4  ;;  %s1407_s14 = int_to_ptr.vmem [resolvable:$false] %s1406_s14 }
  0x12   : > { %v635_v28 = vld [vmem:[%s1813_s6 + $0x28] sm:$0xff] (!%p309_p9)  ;;  %v636_v31 = vld [vmem:[%s1813_s6 + $0x30] sm:$0xff] (!%p309_p9)  ;;  %v637_v32 = vld [vmem:[%s1813_s6 + $0x38] sm:$0xff] (!%p309_p9) }
  0x13   : > { %403 = vperm.xlu0 (!%p309_p9), %1364, %v389_v4   ;;  %v817_v34 = vld [vmem:[%s1815_s8] sm:$0xff] (!%p309_p9)  ;;  %v381_v44 = vld [vmem:[%s1810_s3 + $0x8] sm:$0xff] (!%p309_p9)  ;;  %v382_v45 = vld [vmem:[%s1810_s3 + $0x10] sm:$0xff] (!%p309_p9) }
  0x14   : > { %413 = vperm.xlu1 (!%p309_p9), %1365, %v391_v5   ;;  %v383_v46 = vld [vmem:[%s1810_s3 + $0x18] sm:$0xff] (!%p309_p9)  ;;  %v384_v47 = vld [vmem:[%s1810_s3 + $0x20] sm:$0xff] (!%p309_p9)  ;;  %v385_v48 = vld [vmem:[%s1810_s3 + $0x28] sm:$0xff] (!%p309_p9) }
  0x15   : > { %s1826_s21 = smov (!%p352_p10, %s1062_s21), 31  ;;  %v386_v49 = vld [vmem:[%s1810_s3 + $0x30] sm:$0xff]  ;;  %v387_v50 = vld [vmem:[%s1810_s3 + $0x38] sm:$0xff]  ;;  %v622_v51 = vld [vmem:[%s1812_s5] sm:$0xff] }
  0x16   : > { %s1063_s28 = sshll.u32 %s1826_s21, 3  ;;  %1212 = vmatprep.mubr.msk.f32.mxu1 %vm678_vm2, %v622_v51 }
  0x17   : > { %s1589_s24 = scalar_lea.vmem %s1807_s0, %s1063_s28  ;;  %418 = vperm.xlu0 %1364, %v392_v13  }
  0x18   : > { %v364_v7 = vld [vmem:[%s1589_s24] sm:$0xff]  ;;  %v365_v8 = vld [vmem:[%s1589_s24 + $0x8] sm:$0xff]  ;;  %v366_v9 = vld [vmem:[%s1589_s24 + $0x10] sm:$0xff]  ;;  %423 = vperm.xlu1 %1365, %v393_v14   ;;  %s1750_s21 = scalar_select %p357_p11, %s1542_s13, 1 }
  0x19   : > { %v1243_v10 = vpack.c.bf16 %v365_v8, %v364_v7  ;;  %v367_v11 = vld [vmem:[%s1589_s24 + $0x18] sm:$0xff]  ;;  %v368_v15 = vld [vmem:[%s1589_s24 + $0x20] sm:$0xff]  ;;  %v369_v16 = vld [vmem:[%s1589_s24 + $0x28] sm:$0xff] }
  0x1a   : > { %v1249_v12 = vpack.c.bf16 %v367_v11, %v366_v9  ;;  %v1255_v19 = vpack.c.bf16 %v369_v16, %v368_v15  ;;  %v370_v22 = vld [vmem:[%s1589_s24 + $0x30] sm:$0xff]  ;;  %v371_v23 = vld [vmem:[%s1589_s24 + $0x38] sm:$0xff]  ;;  %v372_v29 = vld [vmem:[%s1589_s24 + $0x40] sm:$0xff]  ;;  %s1064_s25 = sshll.u32 %s1750_s21, 3  ;;  %s363_s16 = scalar_lea.vmem %s1809_s2, %s1750_s21 }
  0x1b   : > { %1245 = vmatprep.subr.msk.bf16.mxu0 %vm1593_vm1, %v1243_v10  ;;  %428 = vperm.xlu0 %1364, %v394_v17   ;;  %v1261_v26 = vpack.c.bf16 %v371_v23, %v370_v22  ;;  %v373_v30 = vld [vmem:[%s1589_s24 + $0x48] sm:$0xff]  ;;  %v374_v35 = vld [vmem:[%s1589_s24 + $0x50] sm:$0xff]  ;;  %v375_v36 = vld [vmem:[%s1589_s24 + $0x58] sm:$0xff]  ;;  %s360_s28 = scalar_lea.vmem %s1808_s1, %s1064_s25 }
  0x1c   : > { %1248 = vmatpush3.bf16.xpose.msk.msra.mxu0 %vm1593_vm1, %v1243_v10  ;;  %433 = vperm.xlu1 %1365, %v395_v18   ;;  %v1267_v33 = vpack.c.bf16 %v373_v30, %v372_v29  ;;  %v1273_v37 = vpack.c.bf16 %v375_v36, %v374_v35  ;;  %v376_v38 = vld [vmem:[%s1589_s24 + $0x60] sm:$0xff]  ;;  %v377_v39 = vld [vmem:[%s1589_s24 + $0x68] sm:$0xff]  ;;  %v378_v41 = vld [vmem:[%s1589_s24 + $0x70] sm:$0xff] }
  0x1d   : > { %1251 = vmatprep.subr.msk.bf16.mxu0 %vm1593_vm1, %v1249_v12  ;;  %v1279_v40 = vpack.c.bf16 %v377_v39, %v376_v38  ;;  %v379_v42 = vld [vmem:[%s1589_s24 + $0x78] sm:$0xff]  ;;  %v628_v29 = vld [vmem:[%s1812_s5 + $0x30] sm:$0xff]  ;;  %s348_s24 = sand.u32 1, %s1456_s10  }
  0x1e   : > { %v1285_v43 = vpack.c.bf16 %v379_v42, %v378_v41  ;;  %v629_v30 = vld [vmem:[%s1812_s5 + $0x38] sm:$0xff]  ;;  %s1061_s17 = sshll.u32 %s348_s24, 2 }
  0x1f   : > { %640 = vperm.xlu0 %1364, %v630_v20   ;;  %s350_s23 = scalar_lea.vmem [#allocation2], %s1061_s17 }
  0x20   : > { %645 = vperm.xlu1 %1365, %v631_v21   ;;  %s977_s21 = sshll.u32 %s350_s23, 4  ;;  %s1767_s21 = int_to_ptr.vmem [resolvable:$true] %s977_s21 }
  0x21   : > { %s1402_s13 = scalar_lea.vmem %s1767_s21, 64  ;;  %p1409_p1 = scmp.lt.s32.totalorder %s1767_s21, %s1407_s14 }
  0x22   : > { %p1403_p12 = scmp.ne.s32.totalorder %s1767_s21, %s1402_s13 }
  0x23   : > { %650 = vperm.xlu0 %1364, %v632_v24   ;;  %v623_v24 = vld [vmem:[%s1812_s5 + $0x8] sm:$0xff] }
  0x24   : > { %1254 = vmatpush3.bf16.xpose.msk.msra.mxu0 %vm1593_vm1, %v1249_v12  ;;  %655 = vperm.xlu1 %1365, %v633_v25   ;;  %v624_v25 = vld [vmem:[%s1812_s5 + $0x10] sm:$0xff]  ;;  %p1404_p13 = pnand %p1403_p12, %p1559_p5 }
  0x25   : > { %1257 = vmatprep.subr.msk.bf16.mxu0 %vm1593_vm1, %v1255_v19 }
  0x26   : > { %p1405_p0 = pneg %p1404_p13 }
  0x27   : > { %660 = vperm.xlu0 %1364, %v634_v27   ;;  %v626_v27 = vld [vmem:[%s1812_s5 + $0x20] sm:$0xff] }
  0x28   : > { %665 = vperm.xlu1 %1365, %v635_v28   ;;  %v627_v28 = vld [vmem:[%s1812_s5 + $0x28] sm:$0xff] }
  0x2b   : > { %670 = vperm.xlu0 %1364, %v636_v31   ;;  %v1467_v31 = vmov 0.0|0.0  }
  0x2c   : > { %1260 = vmatpush3.bf16.xpose.msk.msra.mxu0 %vm1593_vm1, %v1255_v19  ;;  %675 = vperm.xlu1 %1365, %v637_v32   ;;  %v1469_v32 = vmov 0.0  }
  0x2d   : > { %1263 = vmatprep.subr.msk.bf16.mxu0 %vm1593_vm1, %v1261_v26 }
  0x2f   : > { %820 = vperm.xlu0 %1364, %v817_v34  }
  0x34   : > { %1266 = vmatpush3.bf16.xpose.msk.msra.mxu0 %vm1593_vm1, %v1261_v26  ;;  %v625_v26 = vld [vmem:[%s1812_s5 + $0x18] sm:$0xff] }
  0x35   : > { %1269 = vmatprep.subr.msk.bf16.mxu0 %vm1593_vm1, %v1267_v33 }
  0x3c   : > { %1272 = vmatpush3.bf16.xpose.msk.msra.mxu0 %vm1593_vm1, %v1267_v33 }
  0x3d   : > { %1275 = vmatprep.subr.msk.bf16.mxu0 %vm1593_vm1, %v1273_v37 }
  0x44   : > { %1278 = vmatpush3.bf16.xpose.msk.msra.mxu0 %vm1593_vm1, %v1273_v37 }
  0x45   : > { %1281 = vmatprep.subr.msk.bf16.mxu0 %vm1593_vm1, %v1279_v40 }
  0x4c   : > { %1284 = vmatpush3.bf16.xpose.msk.msra.mxu0 %vm1593_vm1, %v1279_v40 }
  0x4d   : > { %1287 = vmatprep.subr.msk.bf16.mxu0 %vm1593_vm1, %v1285_v43 }
  0x54   : > { %1290 = vmatpush3.bf16.xpose.msk.msra.mxu0 %vm1593_vm1, %v1285_v43 }
  0x5b   : > { %1185 = vmatmul.mubr.msk.f32.vlgmr.msra.gmra.mrb[0].mxu0 %vm436_vm0, %v381_v44 }
  0x5c   : > { %1187 = vmatprep.mubr.msk.f32.mxu0 %vm436_vm0, %v382_v45 }
  0x5f   : > { %1188 = vmatmul.mubr.msk.f32.gmra.mrb[2].mxu0 %vm436_vm0, %v383_v46 }
  0x60   : > { %1190 = vmatprep.mubr.msk.f32.mxu0 %vm436_vm0, %v384_v47 }
  0x63   : > { %1191 = vmatmul.mubr.msk.f32.gmra.mrb[4].mxu0 %vm436_vm0, %v385_v48 }
  0x64   : > { %1193 = vmatprep.mubr.msk.f32.mxu0 %vm436_vm0, %v386_v49 }
  0x67   : > { %1194 = vmatmul.mubr.msk.f32.gmra.mrb[6].mxu0 %vm436_vm0, %v387_v50 }
  0x8e   : > { %v399_v52 = vpop.permute.xlu0 %398 }
  0x8f   : > { %v409_v53 = vpop.permute.xlu1 %408 }
  0x92   : > { %v404_v54 = vpop.permute.xlu0 %403 }
  0x93   : > { %v414_v55 = vpop.permute.xlu1 %413 }
  0x96   : > { %v419_v1 = vpop.permute.xlu0 %418 }
  0x97   : > { %v424_v63 = vpop.permute.xlu1 %423 }
  0x9a   : > { %v429_v9 = vpop.permute.xlu0 %428 }
  0x9b   : > { %v434_v6 = vpop.permute.xlu1 %433 }
  0x9e   : > { %v641_v34 = vpop.permute.xlu0 %640 }
  0x9f   : > { %v646_v33 = vpop.permute.xlu1 %645 }
  0xa2   : > { %v651_v37 = vpop.permute.xlu0 %650 }
  0xa3   : > { %v656_v35 = vpop.permute.xlu1 %655 }
  0xa6   : > { %v661_v46 = vpop.permute.xlu0 %660 }
  0xa7   : > { %v666_v44 = vpop.permute.xlu1 %665 }
  0xab   : > { %v676_v51 = vpop.permute.xlu1 %675 }
 0x12e   : > { %v1186_v56 = vpop.f32.mrb[0].mxu0 }
 0x12f   : > { %v581_v57 = vadd.f32 %v1186_v56, %v404_v54  ;;  %v575_v58 = vpop.f32.mrb[1].mxu0  ;;  %v671_v54 = vpop.permute.xlu0 %670 }
 0x130   : > { %v576_v59 = vadd.f32 %v575_v58, %v399_v52 }
 0x131   : > { %1366 = vtanh.f32 %v581_v57 }
 0x132   : > { %1368 = vtanh.f32 %v576_v59  ;;  %v1189_v60 = vpop.f32.mrb[2].mxu0 }
 0x133   : > { %v591_v61 = vadd.f32 %v1189_v60, %v414_v55  ;;  %v585_v62 = vpop.f32.mrb[3].mxu0 }
 0x134   : > { %v586_v0 = vadd.f32 %v585_v62, %v409_v53 }
 0x135   : > { %1370 = vtanh.f32 %v591_v61 }
 0x136   : > { %1372 = vtanh.f32 %v586_v0  ;;  %v1192_v2 = vpop.f32.mrb[4].mxu0 }
 0x137   : > { %v601_v3 = vadd.f32 %v1192_v2, %v424_v63  ;;  %v595_v4 = vpop.f32.mrb[5].mxu0 }
 0x138   : > { %v596_v5 = vadd.f32 %v595_v4, %v419_v1 }
 0x139   : > { %1374 = vtanh.f32 %v601_v3 }
 0x13a   : > { %1376 = vtanh.f32 %v596_v5  ;;  %v1195_v7 = vpop.f32.mrb[6].mxu0  ;;  %v816_v5 = vld [vmem:[%s1814_s7] sm:$0xff] }
 0x13b   : > { %v1367_v8 = vpop.eup %1366  ;;  %v611_v10 = vadd.f32 %v1195_v7, %v434_v6  ;;  %v605_v11 = vpop.f32.mrb[7].mxu0 }
 0x13c   : > { %v1369_v12 = vpop.eup %1368  ;;  %v606_v13 = vadd.f32 %v605_v11, %v429_v9  ;;  %v821_v6 = vpop.permute.xlu0 %820 }
 0x13d   : > { %1378 = vtanh.f32 %v611_v10  ;;  %v1291_v14 = vpack.c.bf16 %v1367_v8, %v1369_v12  ;;  %v915_v8 = vld [vmem:[%s360_s28] sm:$0xff]  ;;  %s964_s28 = scalar_lea.sflag [#allocation3], %s348_s24 }
 0x13e   : > { %1380 = vtanh.f32 %v606_v13 }
 0x13f   : > { %v1371_v15 = vpop.eup %1370  ;;  %1292 = vmatprep.subr.bf16.mxu1 %v1291_v14 }
 0x140   : > { %v1373_v16 = vpop.eup %1372  ;;  %1294 = vmatpush3.bf16.msra.mxu1 %v1291_v14 }
 0x141   : > { %v1295_v17 = vpack.c.bf16 %v1371_v15, %v1373_v16 }
 0x143   : > { %v1375_v18 = vpop.eup %1374  ;;  %1296 = vmatprep.subr.bf16.mxu1 %v1295_v17 }
 0x144   : > { %v1377_v19 = vpop.eup %1376  ;;  %1298 = vmatpush3.bf16.msra.mxu1 %v1295_v17  ;;  %v896_v17 = vlaneseq }
 0x145   : > { %v1299_v20 = vpack.c.bf16 %v1375_v18, %v1377_v19 }
 0x147   : > { %v1379_v21 = vpop.eup %1378  ;;  %1300 = vmatprep.subr.bf16.mxu1 %v1299_v20 }
 0x148   : > { %v1381_v22 = vpop.eup %1380  ;;  %1302 = vmatpush3.bf16.msra.mxu1 %v1299_v20 }
 0x149   : > { %v1303_v23 = vpack.c.bf16 %v1379_v21, %v1381_v22  ;;  %v897_v22 = vshrl.u32 %v896_v17, 7 }
 0x14b   : > { %1304 = vmatprep.subr.bf16.mxu1 %v1303_v23 }
 0x14c   : > { %1306 = vmatpush3.bf16.msra.mxu1 %v1303_v23 }
 0x14d   : > { %1307 = vmatprep.subr.bf16.mxu1 %v1467_v31 }
 0x14f   : > { %1213 = vmatmul.mubr.msk.f32.vlgmr.msra.gmra.mrb[0].mxu1 %vm678_vm2, %v623_v24 }
 0x150   : > { %1215 = vmatprep.mubr.msk.f32.mxu1 %vm678_vm2, %v624_v25  ;;  %v923_v25 = vcvt.s32.f32 %v897_v22 }
 0x153   : > { %1216 = vmatmul.mubr.msk.f32.gmra.mrb[2].mxu1 %vm678_vm2, %v625_v26 }
 0x154   : > { %1218 = vmatprep.mubr.msk.f32.mxu1 %vm678_vm2, %v626_v27 }
 0x157   : > { %1219 = vmatmul.mubr.msk.f32.gmra.mrb[4].mxu1 %vm678_vm2, %v627_v28 }
 0x158   : > { %1221 = vmatprep.mubr.msk.f32.mxu1 %vm678_vm2, %v628_v29 }
 0x15b   : > { %1222 = vmatmul.mubr.msk.f32.gmra.mrb[6].mxu1 %vm678_vm2, %v629_v30 }
 0x15c   : > { %1240 = vmatprep.mubr.msk.f32.mxu1 %vm1468_vm3, %v1469_v32 }
 0x222   : > { %v1214_v36 = vpop.f32.mrb[0].mxu1 }
 0x223   : > { %v775_v38 = vadd.f32 %v1214_v36, %v646_v33  ;;  %v769_v39 = vpop.f32.mrb[1].mxu1 }
 0x224   : > { %v770_v40 = vadd.f32 %v769_v39, %v641_v34 }
 0x225   : > { %1382 = vtanh.f32 %v775_v38 }
 0x226   : > { %1384 = vtanh.f32 %v770_v40  ;;  %v1217_v41 = vpop.f32.mrb[2].mxu1 }
 0x227   : > { %v785_v42 = vadd.f32 %v1217_v41, %v656_v35  ;;  %v779_v43 = vpop.f32.mrb[3].mxu1 }
 0x228   : > { %v780_v45 = vadd.f32 %v779_v43, %v651_v37 }
 0x229   : > { %1386 = vtanh.f32 %v785_v42 }
 0x22a   : > { %1388 = vtanh.f32 %v780_v45  ;;  %v1220_v47 = vpop.f32.mrb[4].mxu1 }
 0x22b   : > { %v795_v48 = vadd.f32 %v1220_v47, %v666_v44  ;;  %v789_v49 = vpop.f32.mrb[5].mxu1 }
 0x22c   : > { %v790_v50 = vadd.f32 %v789_v49, %v661_v46 }
 0x22d   : > { %1390 = vtanh.f32 %v795_v48 }
 0x22e   : > { %1392 = vtanh.f32 %v790_v50  ;;  %v1223_v52 = vpop.f32.mrb[6].mxu1 }
 0x22f   : > { %v1383_v53 = vpop.eup %1382  ;;  %v805_v55 = vadd.f32 %v1223_v52, %v676_v51  ;;  %v799_v56 = vpop.f32.mrb[7].mxu1 }
 0x230   : > { %v1385_v57 = vpop.eup %1384  ;;  %v800_v58 = vadd.f32 %v799_v56, %v671_v54 }
 0x231   : > { %1394 = vtanh.f32 %v805_v55  ;;  %v1308_v59 = vpack.c.bf16 %v1383_v53, %v1385_v57 }
 0x232   : > { %1396 = vtanh.f32 %v800_v58 }
 0x233   : > { %v1387_v60 = vpop.eup %1386  ;;  %1309 = vmatpush3.bf16.msra.mxu1 %v1308_v59 }
 0x234   : > { %v1389_v61 = vpop.eup %1388  ;;  %1310 = vmatprep.subr.bf16.mxu1 %v1467_v31 }
 0x235   : > { %v1311_v62 = vpack.c.bf16 %v1387_v60, %v1389_v61 }
 0x237   : > { %v1391_v63 = vpop.eup %1390  ;;  %1312 = vmatpush3.bf16.msra.mxu1 %v1311_v62 }
 0x238   : > { %v1393_v0 = vpop.eup %1392  ;;  %1313 = vmatprep.subr.bf16.mxu1 %v1467_v31 }
 0x239   : > { %v1314_v1 = vpack.c.bf16 %v1391_v63, %v1393_v0 }
 0x23b   : > { %v1395_v2 = vpop.eup %1394  ;;  %1315 = vmatpush3.bf16.msra.mxu1 %v1314_v1 }
 0x23c   : > { %v1397_v3 = vpop.eup %1396  ;;  %1316 = vmatprep.subr.bf16.mxu1 %v1467_v31  ;;  %v1098_v31 = vld [vmem:[%s363_s16] ss:$0 sm:$0xff]  ;;  %s1408_s16 = scalar_lea.vmem %s1407_s14, 128 }
 0x23d   : > { %v1317_v4 = vpack.c.bf16 %v1395_v2, %v1397_v3  ;;  %vm948_vm5 = vcmp.eq.s32.totalorder %v897_v22, %v1098_v31  ;;  %p1410_p2 = scmp.lt.s32.totalorder %s1408_s16, %s1402_s13 }
 0x23f   : > { %1318 = vmatpush3.bf16.msra.mxu1 %v1317_v4  ;;  %p1411_p3 = por %p1410_p2, %p1409_p1 }
 0x241   : > { %p1412_p4 = pnand %p1411_p3, %p1405_p0 }
 0x242   : > { %1241 = vmatmul.mubr.msk.f32.vlgmr.msra.gmra.mrb[8].mxu1 %vm678_vm2, %v816_v5 }
 0x315   : > { %v892_v7 = vpop.f32.mrb[8].mxu1 }
 0x316   : > { %v893_v9 = vadd.f32 %v892_v7, %v821_v6  ;;  %v1242_v10 = vpop.f32.mrb[9].mxu1 }
 0x318   : > { %v898_v11 = vrot.slane %v893_v9, 4  ;;  %v916_v12 = vadd.f32 %v915_v8, %v893_v9  ;;  %v949_v35 = vsel %vm948_vm5, %v893_v9, 0.0 }
 0x319   : > { %v950_v38 = vrot.slane %v949_v35, 4 }
 0x31a   : > { %v899_v13 = vmax.f32 %v893_v9, %v898_v11  ;;  %v917_v14 = vrot.slane %v916_v12, 4 }
 0x31b   : > { %v951_v44 = vadd.f32 %v950_v38, %v949_v35 }
 0x31c   : > { %v918_v15 = vmax.f32 %v916_v12, %v917_v14  ;;  %v900_v16 = vrot.slane %v899_v13, 2 }
 0x31d   : > { %v952_v49 = vrot.slane %v951_v44, 2 }
 0x31e   : > { %v901_v18 = vmax.f32 %v899_v13, %v900_v16  ;;  %v919_v19 = vrot.slane %v918_v15, 2 }
 0x31f   : > { %v953_v54 = vadd.f32 %v952_v49, %v951_v44 }
 0x320   : > { %v902_v20 = vrot.slane %v901_v18, 1  ;;  %v920_v21 = vmax.f32 %v918_v15, %v919_v19 }
 0x321   : > { %v954_v57 = vrot.slane %v953_v54, 1 }
 0x322   : > { %v903_v23 = vmax.f32 %v901_v18, %v902_v20  ;;  %v921_v24 = vrot.slane %v920_v21, 1 }
 0x323   : > { %v955_v59 = vadd.f32 %v954_v57, %v953_v54 }
 0x324   : > { %v904_v26 = vsub.f32 %v893_v9, %v903_v23  ;;  %v922_v27 = vmax.f32 %v920_v21, %v921_v24 }
 0x325   : > { %v956_v63 = vsub.f32 %v955_v59, %v903_v23 }
 0x326   : > { %v905_v28 = vmul.f32 1.442695, %v904_v26  ;;  %vm924_vm4 = vcmp.eq.f32.partialorder %v916_v12, %v922_v27 }
 0x327   : > { %v925_v29 = vsel %vm924_vm4, %v923_v25, 8.0 }
 0x328   : > { %1398 = vpow2.f32 %v905_v28  ;;  %v926_v30 = vrot.slane %v925_v29, 4 }
 0x32a   : > { %v927_v32 = vmin.f32 %v925_v29, %v926_v30 }
 0x32c   : > { %v928_v33 = vrot.slane %v927_v32, 2 }
 0x32e   : > { %v929_v34 = vmin.f32 %v927_v32, %v928_v33 }
 0x330   : > { %v930_v36 = vrot.slane %v929_v34, 1 }
 0x332   : > { %v1399_v37 = vpop.eup %1398  ;;  %v931_v39 = vmin.f32 %v929_v34, %v930_v36 }
 0x333   : > { %v907_v40 = vrot.slane %v1399_v37, 4 }
 0x334   : > { %v1319_v41 = vtrunc.f32 %v931_v39 }
 0x335   : > { %v908_v42 = vadd.f32 %v1399_v37, %v907_v40 }
 0x336   : > { %v1320_v43 = vcvt.f32.s32 %v1319_v41 }
 0x337   : > { %v909_v45 = vrot.slane %v908_v42, 2 }
 0x338   : > { %vm933_vm6 = vcmp.eq.s32.totalorder %v897_v22, %v1320_v43 }
 0x339   : > { %v910_v46 = vadd.f32 %v909_v45, %v908_v42  ;;  %v934_v47 = vsel %vm933_vm6, %v893_v9, 0.0 }
 0x33a   : > { %v935_v48 = vrot.slane %v934_v47, 4 }
 0x33b   : > { %v911_v50 = vrot.slane %v910_v46, 1 }
 0x33c   : > { %v936_v51 = vadd.f32 %v935_v48, %v934_v47 }
 0x33d   : > { %v912_v52 = vadd.f32 %v911_v50, %v910_v46 }
 0x33e   : > { %v937_v53 = vrot.slane %v936_v51, 2 }
 0x33f   : > { %1400 = vlog2.f32 %v912_v52 }
 0x340   : > { %v938_v55 = vadd.f32 %v937_v53, %v936_v51 }
 0x342   : > { %v939_v56 = vrot.slane %v938_v55, 1 }
 0x344   : > { %v940_v58 = vadd.f32 %v939_v56, %v938_v55 }
 0x346   : > { %v941_v62 = vsub.f32 %v940_v58, %v903_v23 }
 0x349   : > { %v1401_v60 = vpop.eup %1400 }
 0x34a   : > { %v914_v61 = vmul.f32 0.6931472, %v1401_v60 }
 0x34c   : > { %v942_v0 = vsub.f32 %v941_v62, %v914_v61  ;;  %v957_v1 = vsub.f32 %v956_v63, %v914_v61 }
 0x34e   : > { %v959_v2 = vsel %vm958_vm7, %v931_v39, %v957_v1 }
 0x34f   : > { %v961_v3 = vsel %vm960_vm8, %v959_v2, %v942_v0 }
 0x350   : > { %962 = vst [vmem:[%s350_s23] sm:$0x7] %v961_v3 }
 0x351   : > { %1415 = shalt.err (!%p1412_p4)
}
 0x352   : > { %s1416_s24 = scalar_lea.hbm %s1765_s27, 64  ;;  %s1420_s23 = scalar_lea.hbm %s1816_s9, 128 }
 0x353   : > { %p1417_p7 = scmp.ne.s32.totalorder %s1765_s27, %s1416_s24  ;;  %p1421_p10 = scmp.lt.u32.totalorder %s1765_s27, %s1816_s9 }
 0x354   : > { %p1422_p11 = scmp.lt.u32.totalorder %s1420_s23, %s1416_s24  ;;  %p1424_p13 = scmp.lt.u32.totalorder %s1416_s24, %s1765_s27 }
 0x355   : > { %p1418_p8 = pnand %p1417_p7, %p1559_p5 }
 0x356   : > { %p1423_p12 = por %p1422_p11, %p1421_p10 }
 0x357   : > { %p1419_p9 = pneg %p1418_p8 }
 0x358   : > { %p1425_p0 = por %p1424_p13, %p1423_p12 }
 0x35a   : > { %p1426_p1 = pnand %p1425_p0, %p1419_p9 }
 0x35c   : > { %1429 = shalt.err (!%p1426_p1)
}
 0x35d   : > { %1321 = dma.vmem_to_hbm [thread:$0]  (%p1559_p5), %s1767_s21, 64, %s1765_s27, %s964_s28  }
 0x35e PF: > { %p1327_p2 = scmp.ge.s32.totalorder %s1464_s12, 2  ;;  %s989_s13 = sand.u32 1, %s1452_s30  }
 0x35f   : > { %s990_s29 = scalar_lea.sflag [#allocation3], %s989_s13 }
 0x360   : > { %p1324_p3 = pnand %p1327_p2, %p1563_p6 }
 0x362   : > { %1447 = dma.done.wait (!%p1324_p3), %s990_s29, 64  }
 0x363   : > { %1449 = vsyncadd (!%p1324_p3), %s990_s29, 4294967232  ;;  %p19_p4 = scmp.ge.s32.totalorder %s1546_s15, 4   ;;  %s1821_s30 = smov %s1456_s10 }
 0x364   : > { %s1822_s10 = smov %s1460_s11  ;;  %s1823_s11 = smov %s1557_s18 }
 0x365   : > { %s1824_s12 = smov %s1546_s15  ;;  %21 = sbr.rel (!%p19_p4) target bundleno = 3 (0x3), region = 97 }
 0x36c   :  { %995 = vsyncpa [#allocation3], 1 }
 0x36d   :  { %997 = vsyncpa [#allocation3 + $0x1], 1 }

</bundles_post_ra>
